<compile_context>
chip_gen: v7x
topology: tpu7x:2x2x1
jax: 0.10.0
libtpu: 0.0.40
codegen_flags: <defaults>
</compile_context>

<pallas_src>
import functools

import jax
import jax.numpy as jnp
from jax.experimental import pallas as pl
from jax.experimental.pallas import tpu as pltpu


def fused_avg_mlp_kernel(x_ref, w1_ref, b1_ref, w2_ref, b2_ref, o_ref, *, inv_m):
    # fc1 for all M models at once (K = S, N = M*H), then bias + ReLU in f32.
    h = jnp.dot(x_ref[...], w1_ref[...], preferred_element_type=jnp.float32)
    h = jnp.maximum(h + b1_ref[...], 0.0)            # b1_ref: (1, M*H) sublane bcast
    # fc2 over the stacked models (K = M*H); ensemble mean = sum * (1/M),
    # applied here as a single VPU multiply on the (TB, Ap) tile.
    y = jnp.dot(h, w2_ref[...], preferred_element_type=jnp.float32)
    o_ref[...] = ((y + b2_ref[...]) * inv_m).astype(o_ref.dtype)
    # TODO(synk): for production M*H, loop over model chunks here with a
    # (TB, A) f32 accumulator scratch to keep the live hidden at (TB, H)
    # (critical for v7x's 64 MiB VMEM); pointless at M*H = 96.


def fold_ensemble_params(w1, b1, w2, b2, *, lane=128):
    """One-time (init-time) layout fold. NOT on the forward hot path.

    w1: [M, S, H]; b1: [M, H]; w2: [M, H, A]; b2: [M, A]
    (weights stored as [in_dim, out_dim] per model, i.e. forward is x @ W + b).
    """
    M, S, H = w1.shape
    A = w2.shape[-1]
    Ap = -(-A // lane) * lane                           # lane-dense output width

    w1_cat = jnp.transpose(w1, (1, 0, 2)).reshape(S, M * H)      # [S, M*H]
    b1_cat = b1.reshape(1, M * H)                                # [1, M*H]
    w2_stk = w2.reshape(M * H, A)                                # [M*H, A], NOT pre-scaled
    w2_stk = jnp.pad(w2_stk, ((0, 0), (0, Ap - A)))              # [M*H, Ap]
    b2_sum = jnp.sum(b2, axis=0, keepdims=True)                  # [1, A] (kernel applies 1/M)
    b2_sum = jnp.pad(b2_sum, ((0, 0), (0, Ap - A)))              # [1, Ap]

    # TODO(synk): for production sizes cast w1_cat/w2_stk (and x) to bf16 here
    # (v5e/v6e MXU) or fp8 with per-channel scales (v7x), keeping f32 accumulation.
    return dict(w1_cat=w1_cat, b1_cat=b1_cat, w2_stk=w2_stk, b2_sum=b2_sum,
                M=M, S=S, H=H, A=A, Ap=Ap)


def average_model_forward(x, params, *, batch_tile=256):
    """x: [B, S] -> [B, A]. `params` comes from fold_ensemble_params (init-time)."""
    B, S = x.shape
    M, H, A, Ap = params["M"], params["H"], params["A"], params["Ap"]
    MH = M * H

    # Batch tile: multiple of 8 sublanes, capped for VMEM (halve cap on v7x).
    TB = min(batch_tile, max(8, -(-B // 8) * 8))
    Bp = -(-B // TB) * TB
    x_p = jnp.pad(x, ((0, Bp - B), (0, 0))) if Bp != B else x
    n_b = Bp // TB

    cost = pl.CostEstimate(
        flops=2 * Bp * S * MH + 2 * Bp * MH * Ap,
        transcendentals=0,
        bytes_accessed=4 * (Bp * S + S * MH + MH + MH * Ap + Ap + Bp * Ap),
    )

    kernel = functools.partial(fused_avg_mlp_kernel, inv_m=1.0 / M)

    out_p = pl.pallas_call(
        kernel,
        out_shape=jax.ShapeDtypeStruct((Bp, Ap), jnp.float32),
        grid_spec=pltpu.PrefetchScalarGridSpec(
            num_scalar_prefetch=0,
            grid=(n_b,),                                   # batch axis: pipelined x/out DMA
            in_specs=[
                pl.BlockSpec((TB, S), lambda i: (i, 0)),   # x tile (double-buffered)
                pl.BlockSpec((S, MH), lambda i: (0, 0)),   # W1 concat: resident
                pl.BlockSpec((1, MH), lambda i: (0, 0)),   # b1 concat: resident
                pl.BlockSpec((MH, Ap), lambda i: (0, 0)),  # W2 stacked (lane-padded): resident
                pl.BlockSpec((1, Ap), lambda i: (0, 0)),   # sum of b2 (lane-padded): resident
            ],
            out_specs=pl.BlockSpec((TB, Ap), lambda i: (i, 0)),   # lane-dense stores
        ),
        compiler_params=pltpu.CompilerParams(
            # Parallel batch axis: shards across v7x's 2 TCs; ~neutral on v5e/v6e.
            dimension_semantics=("parallel",),
            # Toy shapes fit the default scoped VMEM easily; for production set
            # vmem_limit_bytes from 2*(TB,S)+2*(TB,Ap)+weights+(TB,M*H) budget.
        ),
        cost_estimate=cost,
    )(x_p, params["w1_cat"], params["b1_cat"], params["w2_stk"], params["b2_sum"])

    return out_p[:B, :A]


def reference_forward(x, w1, b1, w2, b2):
    h = jax.nn.relu(jnp.einsum("bs,msh->mbh", x, w1) + b1[:, None, :])
    y = jnp.einsum("mbh,mha->mba", h, w2) + b2[:, None, :]
    return jnp.mean(y, axis=0)


if __name__ == "__main__":
    # AverageModel(state_dim=4, hidden_dim=32, action_dim=8, model_num=3)
    batch, state_dim, hidden_dim, action_dim, model_num = 2, 4, 32, 8, 3

    key = jax.random.PRNGKey(0)
    kx, k1, k2, k3, k4 = jax.random.split(key, 5)

    x = jax.random.normal(kx, (batch, state_dim), dtype=jnp.float32)

    # PyTorch Linear default init: U(-1/sqrt(fan_in), 1/sqrt(fan_in))
    lim1 = 1.0 / jnp.sqrt(state_dim)
    lim2 = 1.0 / jnp.sqrt(hidden_dim)
    w1 = jax.random.uniform(k1, (model_num, state_dim, hidden_dim),
                            minval=-lim1, maxval=lim1, dtype=jnp.float32)
    b1 = jax.random.uniform(k2, (model_num, hidden_dim),
                            minval=-lim1, maxval=lim1, dtype=jnp.float32)
    w2 = jax.random.uniform(k3, (model_num, hidden_dim, action_dim),
                            minval=-lim2, maxval=lim2, dtype=jnp.float32)
    b2 = jax.random.uniform(k4, (model_num, action_dim),
                            minval=-lim2, maxval=lim2, dtype=jnp.float32)

    # One-time fold (model init), then the hot-path forward.
    params = fold_ensemble_params(w1, b1, w2, b2)
    out = average_model_forward(x, params)
    out = jax.block_until_ready(out)

    ref = reference_forward(x, w1, b1, w2, b2)
    assert out.shape == (batch, action_dim)
    assert jnp.allclose(out, ref, atol=1e-5, rtol=1e-5), "mismatch vs JAX reference"

    print("KERNEL_OK")
</pallas_src>

<mosaic_0001>
module attributes {stable_mosaic.version = 11 : i64} {
  func.func @fused_avg_mlp_kernel(%arg0: i32, %arg1: memref<8x4xf32, #tpu.memory_space<vmem>>, %arg2: memref<4x96xf32, #tpu.memory_space<vmem>>, %arg3: memref<1x96xf32, #tpu.memory_space<vmem>>, %arg4: memref<96x128xf32, #tpu.memory_space<vmem>>, %arg5: memref<1x128xf32, #tpu.memory_space<vmem>>, %arg6: memref<8x128xf32, #tpu.memory_space<vmem>>) attributes {dimension_semantics = [#tpu.dimension_semantics<parallel>], iteration_bounds = array<i64: 1>, scalar_prefetch = 0 : i64, scratch_operands = 0 : i64, tpu.core_type = #tpu.core_type<tc>, window_params = [{transform_indices = @transform_0, window_bounds = array<i64: 8, 4>}, {pipeline_mode = #tpu.pipeline_mode<synchronous>, transform_indices = @transform_1, window_bounds = array<i64: 4, 96>}, {pipeline_mode = #tpu.pipeline_mode<synchronous>, transform_indices = @transform_2, window_bounds = array<i64: 1, 96>}, {pipeline_mode = #tpu.pipeline_mode<synchronous>, transform_indices = @transform_3, window_bounds = array<i64: 96, 128>}, {pipeline_mode = #tpu.pipeline_mode<synchronous>, transform_indices = @transform_4, window_bounds = array<i64: 1, 128>}, {transform_indices = @transform_5, window_bounds = array<i64: 8, 128>}]} {
    %c0 = arith.constant 0 : index
    %c0_0 = arith.constant 0 : index
    %0 = vector.load %arg1[%c0, %c0_0] : memref<8x4xf32, #tpu.memory_space<vmem>>, vector<8x4xf32>
    %c0_1 = arith.constant 0 : index
    %c0_2 = arith.constant 0 : index
    %1 = vector.load %arg2[%c0_1, %c0_2] : memref<4x96xf32, #tpu.memory_space<vmem>>, vector<4x96xf32>
    %cst = arith.constant dense<0.000000e+00> : vector<8x96xf32>
    %2 = tpu.matmul %0, %1, %cst {dimension_numbers = #tpu.dot_dimension_numbers<[1], [0], [0], [1], [0, 0, 1, 1], [], []>} : vector<8x4xf32>, vector<4x96xf32>, vector<8x96xf32> -> vector<8x96xf32>
    %c0_3 = arith.constant 0 : index
    %c0_4 = arith.constant 0 : index
    %3 = vector.load %arg3[%c0_3, %c0_4] : memref<1x96xf32, #tpu.memory_space<vmem>>, vector<1x96xf32>
    %4 = vector.broadcast %3 : vector<1x96xf32> to vector<8x96xf32>
    %5 = arith.addf %2, %4 : vector<8x96xf32>
    %cst_5 = arith.constant 0.000000e+00 : f32
    %6 = vector.broadcast %cst_5 : f32 to vector<8x96xf32>
    %7 = arith.maximumf %5, %6 : vector<8x96xf32>
    %c0_6 = arith.constant 0 : index
    %c0_7 = arith.constant 0 : index
    %8 = vector.load %arg4[%c0_6, %c0_7] : memref<96x128xf32, #tpu.memory_space<vmem>>, vector<96x128xf32>
    %cst_8 = arith.constant dense<0.000000e+00> : vector<8x128xf32>
    %9 = tpu.matmul %7, %8, %cst_8 {dimension_numbers = #tpu.dot_dimension_numbers<[1], [0], [0], [1], [0, 0, 1, 1], [], []>} : vector<8x96xf32>, vector<96x128xf32>, vector<8x128xf32> -> vector<8x128xf32>
    %c0_9 = arith.constant 0 : index
    %c0_10 = arith.constant 0 : index
    %10 = vector.load %arg5[%c0_9, %c0_10] : memref<1x128xf32, #tpu.memory_space<vmem>>, vector<1x128xf32>
    %11 = vector.broadcast %10 : vector<1x128xf32> to vector<8x128xf32>
    %12 = arith.addf %9, %11 : vector<8x128xf32>
    %cst_11 = arith.constant 0.333333343 : f32
    %13 = vector.broadcast %cst_11 : f32 to vector<8x128xf32>
    %14 = arith.mulf %12, %13 : vector<8x128xf32>
    %c0_12 = arith.constant 0 : index
    %c0_13 = arith.constant 0 : index
    %15 = vector.load %arg6[%c0_12, %c0_13] : memref<8x128xf32, #tpu.memory_space<vmem>>, vector<8x128xf32>
    tpu.vector_store %arg6[%c0_12, %c0_13], %14 {strides = array<i32>} : memref<8x128xf32, #tpu.memory_space<vmem>>, vector<8x128xf32>,
    return
  }
  func.func @transform_0(%arg0: i32) -> (i32, i32) {
    %c0_i32 = arith.constant 0 : i32
    %c0_i32_0 = arith.constant 0 : i32
    return %arg0, %c0_i32 : i32, i32
  }
  func.func @transform_1(%arg0: i32) -> (i32, i32) {
    %c0_i32 = arith.constant 0 : i32
    %c0_i32_0 = arith.constant 0 : i32
    %c0_i32_1 = arith.constant 0 : i32
    return %c0_i32, %c0_i32_0 : i32, i32
  }
  func.func @transform_2(%arg0: i32) -> (i32, i32) {
    %c0_i32 = arith.constant 0 : i32
    %c0_i32_0 = arith.constant 0 : i32
    %c0_i32_1 = arith.constant 0 : i32
    return %c0_i32, %c0_i32_0 : i32, i32
  }
  func.func @transform_3(%arg0: i32) -> (i32, i32) {
    %c0_i32 = arith.constant 0 : i32
    %c0_i32_0 = arith.constant 0 : i32
    %c0_i32_1 = arith.constant 0 : i32
    return %c0_i32, %c0_i32_0 : i32, i32
  }
  func.func @transform_4(%arg0: i32) -> (i32, i32) {
    %c0_i32 = arith.constant 0 : i32
    %c0_i32_0 = arith.constant 0 : i32
    %c0_i32_1 = arith.constant 0 : i32
    return %c0_i32, %c0_i32_0 : i32, i32
  }
  func.func @transform_5(%arg0: i32) -> (i32, i32) {
    %c0_i32 = arith.constant 0 : i32
    %c0_i32_0 = arith.constant 0 : i32
    return %arg0, %c0_i32 : i32, i32
  }
}

</mosaic_0001>

<bundles_post_ra>
// kernel: tpu_custom_call.1
= control target key start
LH: loop header
LB: loop body
LE: loop exit
PB: predicated region body
PF: predicated region fallthrough
CT: control target
= control target key end

     0   :  { %10 = vsyncpa [#allocation3], 0  ;;  %s431_s0 = inlined_call_operand.vmem [shape: f32[8,4], index: 0, kind: input, shape index: {}]   ;;  %s432_s1 = inlined_call_operand.vmem [shape: f32[4,96], index: 1, kind: input, shape index: {}]   ;;  %s433_s2 = inlined_call_operand.vmem [shape: f32[1,96], index: 2, kind: input, shape index: {}]   ;;  %s434_s3 = inlined_call_operand.hbm [shape: f32[96,128], index: 3, kind: input, shape index: {}]   ;;  %s435_s4 = inlined_call_operand.vmem [shape: f32[1,128], index: 4, kind: input, shape index: {}]   ;;  %s436_s5 = inlined_call_operand.hbm [shape: f32[8,128], index: 5, kind: output, shape index: {}]  }
   0x1   :  { %11 = vsyncpa [#allocation4], 0  ;;  %s358_s18 = smov [#allocation2]   ;;  %s310_s22 = scalar_lea.hbm %s434_s3, 1536 }
   0x2   :  { %s23_s19 = sshll.u32 %s358_s18, 4  ;;  %p311_p0 = scmp.ne.s32.totalorder %s434_s3, %s310_s22  ;;  %s24_s19 = int_to_ptr.vmem [resolvable:$true] %s23_s19 }
   0x3   :  { %p314_p1 = scmp.lt.u32.totalorder %s310_s22, %s434_s3 }
   0x5   :  { %p316_p2 = pnand %p314_p1, %p311_p0 }
   0x7   :  { %319 = shalt.err (!%p316_p2)
}
   0x8   :  { %s320_s27 = scalar_lea.vmem %s24_s19, 1536  ;;  %p325_p4 = scmp.lt.s32.totalorder %s24_s19, %s24_s19 }
   0x9   :  { %p321_p3 = scmp.ne.s32.totalorder %s24_s19, %s320_s27  ;;  %p326_p5 = scmp.lt.s32.totalorder %s320_s27, %s320_s27 }
   0xb   :  { %p327_p6 = por %p326_p5, %p325_p4 }
   0xd   :  { %p328_p7 = pnand %p327_p6, %p321_p3 }
   0xf   :  { %331 = shalt.err (!%p328_p7)
}
  0x10   :  { %s359_s28 = smov 128   ;;  %s360_s29 = smov 8  }
  0x11   :  { %29 = dma.hbm_to_vmem [thread:$0]  %s434_s3, 1536, %s24_s19, [#allocation3], %s359_s28, %s359_s28, %s360_s29  }
  0x12   :  { %354 = dma.done.wait [#allocation3], 1536  }
  0x13   :  { %355 = vsyncadd [#allocation3], 4294965760  ;;  %v361_v0 = vmov 0.0   ;;  %vm362_vm0 = vmmov 0   ;;  %v363_v1 = vmov 0.0|0.0   ;;  %vm48_vm1 = vcmask 1043456  }
  0x14   :  { %253 = vmatprep.subr.mxu0 %v361_v0  ;;  %255 = vmatprep.mubr.msk.f32.mxu0 %vm362_vm0, %v361_v0  ;;  %vm44_vm2 = vcmask 31744   ;;  %v36_v2 = vld [vmem:[%s432_s1] sm:$0xf]  ;;  %v124_v5 = vld [vmem:[#allocation2 + $0x8] sm:$0xff]  ;;  %v125_v6 = vld [vmem:[#allocation2 + $0x10] sm:$0xff]  ;;  %vm142_vm3 = vcmask 785408  }
  0x15   :  { %285 = vmatprep.subr.bf16.mxu1 %v363_v1  ;;  %282 = vmatprep.mubr.msk.f32.mxu1 %vm362_vm0, %v361_v0  ;;  %v35_v3 = vld [vmem:[%s431_s0] sm:$0xff]  ;;  %v126_v7 = vld [vmem:[#allocation2 + $0x18] sm:$0xff]  ;;  %v128_v11 = vld [vmem:[#allocation2 + $0x28] sm:$0xff]  ;;  %s364_s12 = smov [#allocation5]  }
  0x16   :  { %v123_v4 = vld [vmem:[#allocation2] sm:$0xff]  ;;  %254 = vmatpush3.msk.msra.mxu0 %vm48_vm1, %v36_v2  ;;  %v289_v9 = vpack.c.bf16 %v126_v7, %v125_v6  ;;  %v129_v13 = vld [vmem:[#allocation2 + $0x30] sm:$0xff]  ;;  %v130_v14 = vld [vmem:[#allocation2 + $0x38] sm:$0xff]  ;;  %s224_s13 = sshll.u32 %s364_s12, 4  ;;  %s225_s13 = int_to_ptr.vmem [resolvable:$true] %s224_s13 }
  0x17   :  { %256 = vmatmul.mubr.msk.f32.vlgmr.msra.gmra.mrb[0].mxu0 %vm44_vm2, %v35_v3  ;;  %v286_v8 = vpack.c.bf16 %v124_v5, %v123_v4  ;;  %v127_v10 = vld [vmem:[#allocation2 + $0x20] sm:$0xff]  ;;  %v295_v15 = vpack.c.bf16 %v130_v14, %v129_v13  ;;  %v132_v17 = vld [vmem:[#allocation2 + $0x48] sm:$0xff]  ;;  %v133_v19 = vld [vmem:[#allocation2 + $0x50] sm:$0xff]  ;;  %s332_s14 = scalar_lea.vmem %s225_s13, 128  ;;  %p337_p9 = scmp.lt.s32.totalorder %s225_s13, %s225_s13 }
  0x18   :  { %v292_v12 = vpack.c.bf16 %v128_v11, %v127_v10  ;;  %v131_v16 = vld [vmem:[#allocation2 + $0x40] sm:$0xff]  ;;  %v134_v20 = vld [vmem:[#allocation2 + $0x58] sm:$0xff]  ;;  %p333_p8 = scmp.ne.s32.totalorder %s225_s13, %s332_s14  ;;  %p338_p10 = scmp.lt.s32.totalorder %s332_s14, %s332_s14 }
  0x19   :  { %287 = vmatpush3.bf16.msra.mxu1 %v286_v8  ;;  %v298_v18 = vpack.c.bf16 %v132_v17, %v131_v16  ;;  %v301_v21 = vpack.c.bf16 %v134_v20, %v133_v19  ;;  %v233_v22 = vld [vmem:[%s433_s2] ss:$0 sm:$0xff] }
  0x1a   :  { %288 = vmatprep.subr.bf16.mxu1 %v363_v1  ;;  %v236_v27 = vld [vmem:[%s435_s4] ss:$0 sm:$0xff]  ;;  %p339_p11 = por %p338_p10, %p337_p9 }
  0x1c   :  { %p340_p12 = pnand %p339_p11, %p333_p8 }
  0x1d   :  { %290 = vmatpush3.bf16.msra.mxu1 %v289_v9 }
  0x1e   :  { %291 = vmatprep.subr.bf16.mxu1 %v363_v1 }
  0x21   :  { %293 = vmatpush3.bf16.msra.mxu1 %v292_v12 }
  0x22   :  { %294 = vmatprep.subr.bf16.mxu1 %v363_v1 }
  0x25   :  { %296 = vmatpush3.bf16.msra.mxu1 %v295_v15 }
  0x26   :  { %297 = vmatprep.subr.bf16.mxu1 %v363_v1 }
  0x29   :  { %299 = vmatpush3.bf16.msra.mxu1 %v298_v18 }
  0x2a   :  { %300 = vmatprep.subr.bf16.mxu1 %v363_v1 }
  0x2d   :  { %302 = vmatpush3.bf16.msra.mxu1 %v301_v21 }
  0xea   :  { %v118_v23 = vpop.f32.mrb[0].mxu0 }
  0xeb   :  { %v119_v24 = vadd.f32 %v233_v22, %v118_v23  ;;  %v257_v25 = vpop.f32.mrb[1].mxu0 }
  0xed   :  { %v122_v26 = vmax.f32 %v119_v24, 0.0 }
  0xef   :  { %283 = vmatmul.mubr.msk.f32.vlgmr.msra.gmra.mrb[0].mxu1 %vm142_vm3, %v122_v26 }
 0x1c2   :  { %v212_v28 = vpop.f32.mrb[0].mxu1 }
 0x1c3   :  { %v213_v29 = vadd.f32 %v236_v27, %v212_v28  ;;  %v284_v30 = vpop.f32.mrb[1].mxu1 }
 0x1c5   :  { %v216_v31 = vmul.f32 0.33333334, %v213_v29 }
 0x1c7   :  { %217 = vst [vmem:[#allocation5] sm:$0xff] %v216_v31 }
 0x1c8   :  { %343 = shalt.err (!%p340_p12)
}
 0x1c9   :  { %s344_s16 = scalar_lea.hbm %s436_s5, 128 }
 0x1ca   :  { %p345_p13 = scmp.ne.s32.totalorder %s436_s5, %s344_s16  ;;  %p348_p0 = scmp.lt.u32.totalorder %s344_s16, %s436_s5 }
 0x1cc   :  { %p350_p1 = pnand %p348_p0, %p345_p13 }
 0x1ce   :  { %353 = shalt.err (!%p350_p1)
}
 0x1cf   :  { %227 = dma.vmem_to_hbm [thread:$0]  %s225_s13, 128, %s436_s5, [#allocation4]  }
 0x1d0   :  { %356 = dma.done.wait [#allocation4], 128  }
 0x1d1   :  { %357 = vsyncadd [#allocation4], 4294967168 }
 0x1d2   :  { %231 = vsyncpa [#allocation3], 1 }
 0x1d3   :  { %232 = vsyncpa [#allocation4], 1 }

</bundles_post_ra>
